<compile_context>
chip_gen: v7x
topology: tpu7x:2x2x1
jax: 0.10.0
libtpu: 0.0.40
codegen_flags: <defaults>
</compile_context>

<pallas_src>
import jax
import jax.numpy as jnp
from jax.experimental import pallas as pl
from jax.experimental.pallas import tpu as pltpu


def _round_up(n, m):
    return ((n + m - 1) // m) * m


def crossnet_kernel(x_ref, wt_ref, bw_ref, bsum_ref, o_ref):
    x0 = x_ref[...].astype(jnp.float32)                        # [TB, D]
    wt = wt_ref[...]                                            # [D, L] (f32)
    n_layers = wt.shape[1]

    # All per-layer <x0, w_l> projections in one MXU matmul.
    c = jnp.dot(x0, wt, preferred_element_type=jnp.float32)    # [TB, L]

    # Scalar recurrence over layers (L is small and static).  The per-layer
    # bias-projection prefixes live in SMEM and splat from sreg for free.
    t = jnp.ones((x0.shape[0], 1), dtype=jnp.float32)          # t_0 = 1
    for l in range(n_layers):
        t = t + t * c[:, l:l + 1] + bw_ref[l]

    # Single elementwise finalize: xl_L = x0 * t_L + sum_l b_l.
    o_ref[...] = (x0 * t + bsum_ref[...]).astype(o_ref.dtype)


def crossnet_forward(x, weights, bias, *, vmem_buffer_budget=16 << 20):
    """x: [B, D]; weights, bias: [L, D] (rows = the PyTorch [D, 1] params).

    Returns [B, D] with the same dtype as x (f32 or bf16 I/O; the kernel
    upcasts to f32 internally).
    """
    B, D = x.shape
    L, _ = weights.shape

    # Tiny batch-independent precompute in plain JAX.
    w32 = weights.astype(jnp.float32)
    b32 = bias.astype(jnp.float32)
    wt = w32.T                                                  # [D, L]
    bwm = b32 @ w32.T                                           # [L, L]: <b_i, w_l>
    mask = (jnp.arange(L)[:, None] < jnp.arange(L)[None, :]).astype(jnp.float32)
    bw = jnp.sum(bwm * mask, axis=0)                            # (L,): sum_{i<l} <b_i, w_l>
    bsum = jnp.sum(b32, axis=0, keepdims=True)                  # [1, D]: sum_l b_l

    # Dtype-aware sublane multiple: f32 -> 8, bf16 -> 16, int8/fp8 -> 32.
    itemsize = jnp.dtype(x.dtype).itemsize
    sublane = max(8, 32 // itemsize)

    # Batch tile from a VMEM byte budget: two streamed arrays (input + output),
    # each double-buffered by the pipeline.  Default 16 MiB budget ->
    # ~4 MiB per grid step at D=128/f32, safe on every TPU generation.
    tb_budget = vmem_buffer_budget // (2 * 2 * itemsize * D)
    tb_budget = max(sublane, (tb_budget // sublane) * sublane)
    # Keep >= 2 grid steps whenever possible so v7x megacore splits the batch.
    # TODO(synk): if a v7x profile shows one idle TensorCore, switch the axis
    # to pltpu.CORE_PARALLEL (measurements show only core_parallel changes codegen).
    half = _round_up(pl.cdiv(_round_up(B, sublane), 2), sublane)
    tb = max(sublane, min(tb_budget, half))
    grid = (pl.cdiv(B, tb),)

    # Explicit VMEM limit: covers the streamed buffers + constants with margin,
    # above v5e's 16 MiB scoped default, within v7x's 64 MiB physical per TC.
    vmem_limit_bytes = min(max(32 << 20, 2 * vmem_buffer_budget), 60 << 20)

    out = pl.pallas_call(
        crossnet_kernel,
        out_shape=jax.ShapeDtypeStruct((B, D), x.dtype),
        grid=grid,
        in_specs=[
            pl.BlockSpec((tb, D), lambda i: (i, 0)),                   # x: batch-tiled
            pl.BlockSpec((D, L), lambda i: (0, 0)),                    # W^T: constant block
            pl.BlockSpec(memory_space=pltpu.MemorySpace.SMEM),         # bw scalars in SMEM
            pl.BlockSpec((1, D), lambda i: (0, 0)),                    # sum of biases
        ],
        out_specs=pl.BlockSpec((tb, D), lambda i: (i, 0)),
        compiler_params=pltpu.CompilerParams(
            dimension_semantics=("parallel",),     # megacore split on v7x
            vmem_limit_bytes=vmem_limit_bytes,
        ),
    )(x, wt, bw, bsum)
    return out


def crossnet_reference(x, weights, bias):
    """Pure-JAX reference mirroring the PyTorch code literally."""
    x0 = x
    x0_ = x0[:, :, None]                                   # [B, D, 1]
    xl = x0
    for l in range(weights.shape[0]):
        w = weights[l][:, None]                            # [D, 1]
        b = bias[l][:, None]                               # [D, 1]
        x0_xl = jnp.matmul(x0_, xl[:, None, :])            # [B, D, D]
        x0_xl_w = jnp.matmul(x0_xl, w) + b                 # [B, D, 1]
        xl = jnp.squeeze(x0_xl_w, axis=2) + xl             # [B, D]
    return xl


if __name__ == "__main__":
    B = 32           # batch
    D = 128          # x0_dim
    L = 3            # number of cross layers

    key = jax.random.PRNGKey(0)
    kx, kw, kb = jax.random.split(key, 3)

    x = jax.random.normal(kx, (B, D), dtype=jnp.float32)

    # Deterministic xavier_normal_ init for [D, 1] params: std = sqrt(2/(D+1)).
    xavier_std = (2.0 / (D + 1)) ** 0.5
    weights = jax.random.normal(kw, (L, D), dtype=jnp.float32) * xavier_std
    bias = jax.random.normal(kb, (L, D), dtype=jnp.float32) * xavier_std

    out = crossnet_forward(x, weights, bias)
    out = jax.block_until_ready(out)

    ref = crossnet_reference(x, weights, bias)
    assert out.shape == (B, D)
    assert jnp.allclose(out, ref, atol=1e-4, rtol=1e-4), "mismatch vs reference"

    print("KERNEL_OK")
</pallas_src>

<mosaic_0001>
module attributes {stable_mosaic.version = 11 : i64} {
  func.func @crossnet_kernel(%arg0: i32, %arg1: memref<16x128xf32, #tpu.memory_space<vmem>>, %arg2: memref<128x3xf32, #tpu.memory_space<vmem>>, %arg3: memref<3xf32, #tpu.memory_space<smem>>, %arg4: memref<1x128xf32, #tpu.memory_space<vmem>>, %arg5: memref<16x128xf32, #tpu.memory_space<vmem>>) attributes {dimension_semantics = [#tpu.dimension_semantics<parallel>], iteration_bounds = array<i64: 2>, scalar_prefetch = 0 : i64, scratch_operands = 0 : i64, tpu.core_type = #tpu.core_type<tc>, window_params = [{transform_indices = @transform_0, window_bounds = array<i64: 16, 128>}, {pipeline_mode = #tpu.pipeline_mode<synchronous>, transform_indices = @transform_1, window_bounds = array<i64: 128, 3>}, {transform_indices = @transform_2, window_bounds = array<i64: 3>}, {pipeline_mode = #tpu.pipeline_mode<synchronous>, transform_indices = @transform_3, window_bounds = array<i64: 1, 128>}, {transform_indices = @transform_4, window_bounds = array<i64: 16, 128>}]} {
    %c0 = arith.constant 0 : index
    %c0_0 = arith.constant 0 : index
    %0 = vector.load %arg1[%c0, %c0_0] : memref<16x128xf32, #tpu.memory_space<vmem>>, vector<16x128xf32>
    %c0_1 = arith.constant 0 : index
    %c0_2 = arith.constant 0 : index
    %1 = vector.load %arg2[%c0_1, %c0_2] : memref<128x3xf32, #tpu.memory_space<vmem>>, vector<128x3xf32>
    %cst = arith.constant dense<0.000000e+00> : vector<16x3xf32>
    %2 = tpu.matmul %0, %1, %cst {dimension_numbers = #tpu.dot_dimension_numbers<[1], [0], [0], [1], [0, 0, 1, 1], [], []>} : vector<16x128xf32>, vector<128x3xf32>, vector<16x3xf32> -> vector<16x3xf32>
    %cst_3 = arith.constant 1.000000e+00 : f32
    %3 = vector.broadcast %cst_3 : f32 to vector<16x1xf32>
    %4 = vector.extract_strided_slice %2 {offsets = [0, 0], sizes = [16, 1], strides = [1, 1]} : vector<16x3xf32> to vector<16x1xf32>
    %5 = arith.mulf %3, %4 : vector<16x1xf32>
    %6 = arith.addf %3, %5 : vector<16x1xf32>
    %c0_4 = arith.constant 0 : index
    %7 = memref.load %arg3[%c0_4] : memref<3xf32, #tpu.memory_space<smem>>
    %8 = vector.broadcast %7 : f32 to vector<16x1xf32>
    %9 = arith.addf %6, %8 : vector<16x1xf32>
    %10 = vector.extract_strided_slice %2 {offsets = [0, 1], sizes = [16, 1], strides = [1, 1]} : vector<16x3xf32> to vector<16x1xf32>
    %11 = arith.mulf %9, %10 : vector<16x1xf32>
    %12 = arith.addf %9, %11 : vector<16x1xf32>
    %c1 = arith.constant 1 : index
    %13 = memref.load %arg3[%c1] : memref<3xf32, #tpu.memory_space<smem>>
    %14 = vector.broadcast %13 : f32 to vector<16x1xf32>
    %15 = arith.addf %12, %14 : vector<16x1xf32>
    %16 = vector.extract_strided_slice %2 {offsets = [0, 2], sizes = [16, 1], strides = [1, 1]} : vector<16x3xf32> to vector<16x1xf32>
    %17 = arith.mulf %15, %16 : vector<16x1xf32>
    %18 = arith.addf %15, %17 : vector<16x1xf32>
    %c2 = arith.constant 2 : index
    %19 = memref.load %arg3[%c2] : memref<3xf32, #tpu.memory_space<smem>>
    %20 = vector.broadcast %19 : f32 to vector<16x1xf32>
    %21 = arith.addf %18, %20 : vector<16x1xf32>
    %22 = vector.broadcast %21 : vector<16x1xf32> to vector<16x128xf32>
    %23 = arith.mulf %0, %22 : vector<16x128xf32>
    %c0_5 = arith.constant 0 : index
    %c0_6 = arith.constant 0 : index
    %24 = vector.load %arg4[%c0_5, %c0_6] : memref<1x128xf32, #tpu.memory_space<vmem>>, vector<1x128xf32>
    %25 = vector.broadcast %24 : vector<1x128xf32> to vector<16x128xf32>
    %26 = arith.addf %23, %25 : vector<16x128xf32>
    %c0_7 = arith.constant 0 : index
    %c0_8 = arith.constant 0 : index
    %27 = vector.load %arg5[%c0_7, %c0_8] : memref<16x128xf32, #tpu.memory_space<vmem>>, vector<16x128xf32>
    tpu.vector_store %arg5[%c0_7, %c0_8], %26 {strides = array<i32>} : memref<16x128xf32, #tpu.memory_space<vmem>>, vector<16x128xf32>,
    return
  }
  func.func @transform_0(%arg0: i32) -> (i32, i32) {
    %c0_i32 = arith.constant 0 : i32
    %c0_i32_0 = arith.constant 0 : i32
    return %arg0, %c0_i32 : i32, i32
  }
  func.func @transform_1(%arg0: i32) -> (i32, i32) {
    %c0_i32 = arith.constant 0 : i32
    %c0_i32_0 = arith.constant 0 : i32
    %c0_i32_1 = arith.constant 0 : i32
    return %c0_i32, %c0_i32_0 : i32, i32
  }
  func.func @transform_2(%arg0: i32) -> i32 {
    %c0_i32 = arith.constant 0 : i32
    %c0_i32_0 = arith.constant 0 : i32
    return %c0_i32 : i32
  }
  func.func @transform_3(%arg0: i32) -> (i32, i32) {
    %c0_i32 = arith.constant 0 : i32
    %c0_i32_0 = arith.constant 0 : i32
    %c0_i32_1 = arith.constant 0 : i32
    return %c0_i32, %c0_i32_0 : i32, i32
  }
  func.func @transform_4(%arg0: i32) -> (i32, i32) {
    %c0_i32 = arith.constant 0 : i32
    %c0_i32_0 = arith.constant 0 : i32
    return %arg0, %c0_i32 : i32, i32
  }
}

</mosaic_0001>

<bundles_post_ra>
// kernel: tpu_custom_call.1
= control target key start
LH: loop header
LB: loop body
LE: loop exit
PB: predicated region body
PF: predicated region fallthrough
CT: control target
= control target key end

     0   :  { %9 = vsyncpa [#allocation4], 0  ;;  %s903_s0 = inlined_call_operand.vmem [shape: f32[32,128], index: 0, kind: input, shape index: {}]   ;;  %s904_s1 = inlined_call_operand.vmem [shape: f32[128,3], index: 1, kind: input, shape index: {}]   ;;  %s905_s2 = inlined_call_operand.vmem [shape: f32[3], index: 2, kind: input, shape index: {}]   ;;  %s906_s3 = inlined_call_operand.vmem [shape: f32[1,128], index: 3, kind: input, shape index: {}]   ;;  %s907_s4 = inlined_call_operand.hbm [shape: f32[32,128], index: 4, kind: output, shape index: {}]  }
   0x1   :  { %10 = vsyncpa [#allocation3], 0 }
   0x2   :  { %12 = vsyncpa [#allocation3 + $0x1], 0  ;;  %s728_s15 = smov 0   ;;  %s730_s16 = smov 0  }
   0x3   :  { %s732_s17 = smov 0   ;;  %s734_s18 = smov 0  }
   0x4 LB: > { %s749_s19 = sadd.s32 4294967295, %s694_s18   ;;  %s453_s20 = sadd.s32 4294967294, %s694_s18   ;;  %s694_s18 = sphi %s734_s18, %s914_s18   ;;  %s690_s17 = sphi %s732_s17, %s913_s17   ;;  %s686_s16 = sphi %s730_s16, %s912_s16   ;;  %s682_s15 = sphi %s728_s15, %s911_s15  }
   0x5   : > { %s753_s21 = sadd.s32 1, %s694_s18   ;;  %s114_s22 = sadd.s32 1, %s690_s17 }
   0x6   : > { %s111_s23 = ssub.s32 %s694_s18, %s753_s21  ;;  %p124_p0 = scmp.ne.s32.totalorder %s690_s17, %s686_s16 }
   0x7   : > { %p112_p1 = scmp.eq.s32.totalorder %s111_s23, 0  ;;  %p125_p2 = scmp.eq.s32.totalorder %s749_s19, 1 }
   0x8   : > { %p130_p3 = scmp.ne.s32.totalorder %s686_s16, %s682_s15  ;;  %p131_p4 = scmp.eq.s32.totalorder %s453_s20, 1 }
   0x9   : > { %s764_s24 = scalar_select %p112_p1, %s690_s17, %s114_s22  }
   0xa   : > { %p766_p5 = por %p125_p2, %p124_p0  ;;  %p770_p6 = por %p131_p4, %p130_p3 }
   0xb   : > { %p454_p7 = scmp.ge.s32.totalorder %s694_s18, 1  ;;  %p138_p8 = scmp.lt.s32.totalorder %s694_s18, 3 }
   0xc   : > { %p570_p9 = scmp.eq.s32.totalorder %s749_s19, 0  ;;  %s154_s30 = sshll.u32 %s905_s2, 4  ;;  %s155_s30 = int_to_ptr.vmem [resolvable:$true] %s154_s30 }
   0xd   : > { %p777_p10 = pnand %p454_p7, %p138_p8  ;;  %s613_s5 = scalar_lea.vmem %s155_s30, 16 }
   0xe   : > { %p614_p13 = scmp.ne.s32.totalorder %s155_s30, %s613_s5  ;;  %p621_p3 = scmp.lt.s32.totalorder %s155_s30, %s155_s30 }
   0xf   : > { %p562_p11 = pneg %p777_p10  ;;  %p622_p4 = scmp.lt.s32.totalorder %s613_s5, %s613_s5 }
  0x11   : > { %p563_p12 = pnand %p570_p9, %p562_p11  ;;  %p623_p7 = por %p622_p4, %p621_p3 }
  0x13   : > { %p615_p0 = pneg %p563_p12 }
  0x15   : > { %p616_p1 = pnand %p615_p0, %p614_p13 }
  0x17   : > { %p617_p2 = pneg %p616_p1 }
  0x19   : > { %p624_p8 = pnand %p623_p7, %p617_p2 }
  0x1b   : > { %627 = shalt.err (!%p624_p8)
}
  0x1c   : > { %s696_s6 = smov [#allocation2]   ;;  %179 = sbr.rel (%p777_p10) target bundleno = 564 (0x234), region = 36 }
  0x1d   : > { %565 = dma.vmem_to_smem (!%p563_p12), %s155_s30, 16, %s696_s6, [#allocation4]  }
  0x23   : > { %673 = dma.done.wait (%p570_p9), [#allocation4], 16  }
  0x24   : > { %675 = vsyncadd (%p570_p9), [#allocation4], 4294967280 }
  0x25   : > { %185 = sfence }
  0x26   : > { %v215_v0 = vld [vmem:[%s904_s1] sm:$0xff]  ;;  %v216_v1 = vld [vmem:[%s904_s1 + $0x8] sm:$0xff]  ;;  %v217_v2 = vld [vmem:[%s904_s1 + $0x10] sm:$0xff]  ;;  %s460_s13 = sshll.u32 %s749_s19, 1  ;;  %v697_v27 = vmov 0   ;;  %s698_s11 = smov 126  }
  0x27   : > { %v524_v3 = vpack.c.bf16 %v216_v1, %v215_v0  ;;  %v218_v4 = vld [vmem:[%s904_s1 + $0x18] sm:$0xff]  ;;  %p207_p9 = scmp.lt.s32.totalorder %s460_s13, 3  ;;  %v219_v6 = vld [vmem:[%s904_s1 + $0x20] sm:$0xff]  ;;  %v220_v7 = vld [vmem:[%s904_s1 + $0x28] sm:$0xff]  ;;  %611 = vset.pattern.permute.xlu0 %v697_v27  ;;  %612 = vset.pattern.permute.xlu1 %v697_v27  ;;  %s699_s12 = smov 127  }
  0x28   : > { %v528_v5 = vpack.c.bf16 %v218_v4, %v217_v2  ;;  %v532_v8 = vpack.c.bf16 %v220_v7, %v219_v6  ;;  %v221_v9 = vld [vmem:[%s904_s1 + $0x30] sm:$0xff]  ;;  %v222_v10 = vld [vmem:[%s904_s1 + $0x38] sm:$0xff]  ;;  %v223_v13 = vld [vmem:[%s904_s1 + $0x40] sm:$0xff]  ;;  %s462_s14 = sld [smem:[#allocation2 + $0x1]]  ;;  %s203_s20 = sand.u32 1, %s686_s16  }
  0x29   : > { %525 = vmatprep.subr.bf16.mxu0 %v524_v3  ;;  %s916_s13 = smov (!%p207_p9, %s460_s13), 3  ;;  %v536_v12 = vpack.c.bf16 %v222_v10, %v221_v9  ;;  %v224_v14 = vld [vmem:[%s904_s1 + $0x48] sm:$0xff]  ;;  %v225_v16 = vld [vmem:[%s904_s1 + $0x50] sm:$0xff]  ;;  %v226_v17 = vld [vmem:[%s904_s1 + $0x58] sm:$0xff]  ;;  %s459_s22 = sshll.u32 %s203_s20, 4 }
  0x2a   : > { %527 = vmatpush3.bf16.msra.mxu0 %v524_v3  ;;  %s461_s29 = sshll.u32 %s916_s13, 3  ;;  %v540_v15 = vpack.c.bf16 %v224_v14, %v223_v13  ;;  %v544_v18 = vpack.c.bf16 %v226_v17, %v225_v16  ;;  %v227_v19 = vld [vmem:[%s904_s1 + $0x60] sm:$0xff]  ;;  %v228_v20 = vld [vmem:[%s904_s1 + $0x68] sm:$0xff]  ;;  %v229_v22 = vld [vmem:[%s904_s1 + $0x70] sm:$0xff]  ;;  %s308_s13 = sld [smem:[#allocation2]] }
  0x2b   : > { %529 = vmatprep.subr.bf16.mxu0 %v528_v5  ;;  %s210_s10 = scalar_lea.vmem %s903_s0, %s461_s29  ;;  %v548_v21 = vpack.c.bf16 %v228_v20, %v227_v19  ;;  %v230_v23 = vld [vmem:[%s904_s1 + $0x78] sm:$0xff]  ;;  %v464_v52 = vld [vmem:[%s906_s3] ss:$0 sm:$0xff]  ;;  %s205_s28 = scalar_lea.vmem [#allocation5], %s459_s22 }
  0x2c   : > { %v822_v11 = vld [vmem:[%s210_s10] sm:$0xff]  ;;  %v552_v24 = vpack.c.bf16 %v230_v23, %v229_v22  ;;  %v214_v25 = vld [vmem:[%s210_s10 + $0x8] sm:$0xff]  ;;  %s463_s10 = sld [smem:[#allocation2 + $0x2]]  ;;  %s379_s29 = sshll.u32 %s205_s28, 4  ;;  %s855_s29 = int_to_ptr.vmem [resolvable:$true] %s379_s29 }
  0x2d   : > { %521 = vmatprep.mubr.f32.mxu0 %v822_v11  ;;  %s470_s30 = sshll.u32 %s749_s19, 8  ;;  %s862_s8 = scalar_lea.sflag [#allocation3], %s203_s20 }
  0x2e   : > { %531 = vmatpush3.bf16.msra.mxu0 %v528_v5  ;;  %v325_v35 = vstv %s462_s14  ;;  %s860_s7 = scalar_lea.hbm %s907_s4, %s470_s30  ;;  %s628_s9 = scalar_lea.vmem %s855_s29, 256 }
  0x2f   : > { %533 = vmatprep.subr.bf16.mxu0 %v532_v8  ;;  %p629_p10 = scmp.ne.s32.totalorder %s855_s29, %s628_s9  ;;  %s700_s19 = smov [#allocation5]  }
  0x30   : > { %v309_v30 = vstv %s308_s13 }
  0x31   : > { %p630_p11 = pnand %p629_p10, %p766_p5 }
  0x32   : > { %535 = vmatpush3.bf16.msra.mxu0 %v532_v8  ;;  %v339_v44 = vstv %s463_s10 }
  0x33   : > { %537 = vmatprep.subr.bf16.mxu0 %v536_v12  ;;  %p631_p12 = pneg %p630_p11 }
  0x36   : > { %539 = vmatpush3.bf16.msra.mxu0 %v536_v12 }
  0x37   : > { %541 = vmatprep.subr.bf16.mxu0 %v540_v15 }
  0x3a   : > { %543 = vmatpush3.bf16.msra.mxu0 %v540_v15 }
  0x3b   : > { %545 = vmatprep.subr.bf16.mxu0 %v544_v18 }
  0x3e   : > { %547 = vmatpush3.bf16.msra.mxu0 %v544_v18 }
  0x3f   : > { %549 = vmatprep.subr.bf16.mxu0 %v548_v21 }
  0x42   : > { %551 = vmatpush3.bf16.msra.mxu0 %v548_v21 }
  0x43   : > { %553 = vmatprep.subr.bf16.mxu0 %v552_v24 }
  0x46   : > { %555 = vmatpush3.bf16.msra.mxu0 %v552_v24 }
  0x49   : > { %522 = vmatmul.mubr.f32.vlgmr.msra.gmra.mrb[0].mxu0 %v214_v25 }
 0x11c   : > { %v523_v26 = vpop.f32.mrb[0].mxu0 }
 0x11d   : > { %v297_v28 = vpop.f32.mrb[1].mxu0  ;;  %v307_v31 = vadd.f32 1.0, %v523_v26 }
 0x11e   : > { %328 = vrot.lane.b32.xlu1 %v297_v28, %s698_s11  ;;  %314 = vrot.lane.b32.xlu0 %v297_v28, %s699_s12  ;;  %v306_v29 = vadd.f32 1.0, %v297_v28 }
 0x11f   : > { %v311_v37 = vadd.f32 %v309_v30, %v307_v31 }
 0x120   : > { %v310_v32 = vadd.f32 %v309_v30, %v306_v29 }
 0x122   : > { %330 = vrot.lane.b32.xlu1 %v523_v26, %s698_s11  ;;  %316 = vrot.lane.b32.xlu0 %v523_v26, %s699_s12  ;;  %s632_s11 = sshll.u32 %s700_s19, 4  ;;  %s633_s11 = int_to_ptr.vmem [resolvable:$false] %s632_s11 }
 0x123   : > { %s634_s12 = scalar_lea.vmem %s633_s11, 512  ;;  %p635_p13 = scmp.lt.s32.totalorder %s855_s29, %s633_s11 }
 0x124   : > { %p636_p0 = scmp.lt.s32.totalorder %s634_s12, %s628_s9 }
 0x126   : > { %p637_p1 = por %p636_p0, %p635_p13 }
 0x128   : > { %p638_p2 = pnand %p637_p1, %p631_p12 }
 0x190   : > { %v315_v33 = vpop.permute.xlu0 %314  ;;  %v329_v38 = vpop.permute.xlu1 %328 }
 0x191   : > { %v320_v34 = vmul.f32 %v315_v33, %v310_v32 }
 0x193   : > { %v322_v36 = vadd.f32 %v320_v34, %v310_v32 }
 0x194   : > { %v317_v39 = vpop.permute.xlu0 %316  ;;  %v331_v47 = vpop.permute.xlu1 %330 }
 0x195   : > { %v326_v40 = vadd.f32 %v325_v35, %v322_v36  ;;  %v321_v41 = vmul.f32 %v317_v39, %v311_v37 }
 0x197   : > { %v334_v42 = vmul.f32 %v329_v38, %v326_v40  ;;  %v323_v43 = vadd.f32 %v321_v41, %v311_v37 }
 0x199   : > { %v327_v45 = vadd.f32 %v325_v35, %v323_v43  ;;  %v336_v46 = vadd.f32 %v334_v42, %v326_v40 }
 0x19b   : > { %v335_v48 = vmul.f32 %v331_v47, %v327_v45  ;;  %v340_v49 = vadd.f32 %v339_v44, %v336_v46 }
 0x19d   : > { %344 = vperm.xlu0 %611, %v340_v49   ;;  %v337_v50 = vadd.f32 %v335_v48, %v327_v45 }
 0x19f   : > { %v341_v51 = vadd.f32 %v339_v44, %v337_v50 }
 0x1a1   : > { %349 = vperm.xlu1 %612, %v341_v51  }
 0x21c   : > { %v345_v53 = vpop.permute.xlu0 %344 }
 0x21d   : > { %v352_v54 = vmul.f32 %v345_v53, %v822_v11 }
 0x21f   : > { %v361_v55 = vadd.f32 %v464_v52, %v352_v54 }
 0x220   : > { %v350_v56 = vpop.permute.xlu1 %349 }
 0x221   : > { %363 = vst [vmem:[%s205_s28] sm:$0xff] %v361_v55  ;;  %v353_v57 = vmul.f32 %v350_v56, %v214_v25 }
 0x223   : > { %v362_v58 = vadd.f32 %v464_v52, %v353_v57 }
 0x225   : > { %364 = vst [vmem:[%s205_s28 + $0x8] sm:$0xff] %v362_v58 }
 0x226   : > { %641 = shalt.err (!%p638_p2)
}
 0x227   : > { %s642_s13 = scalar_lea.hbm %s860_s7, 256  ;;  %s646_s20 = scalar_lea.hbm %s907_s4, 512 }
 0x228   : > { %p643_p3 = scmp.ne.s32.totalorder %s860_s7, %s642_s13  ;;  %p647_p8 = scmp.lt.u32.totalorder %s860_s7, %s907_s4 }
 0x229   : > { %p648_p9 = scmp.lt.u32.totalorder %s646_s20, %s642_s13  ;;  %p650_p11 = scmp.lt.u32.totalorder %s642_s13, %s860_s7 }
 0x22a   : > { %p644_p4 = pnand %p643_p3, %p766_p5 }
 0x22b   : > { %p649_p10 = por %p648_p9, %p647_p8 }
 0x22c   : > { %p645_p7 = pneg %p644_p4 }
 0x22d   : > { %p651_p12 = por %p650_p11, %p649_p10 }
 0x22f   : > { %p652_p13 = pnand %p651_p12, %p645_p7 }
 0x231   : > { %655 = shalt.err (!%p652_p13)
}
 0x232   : > { %s701_s27 = smov 128   ;;  %s702_s28 = smov 8  }
 0x233   : > { %560 = dma.vmem_to_hbm [thread:$0]  (%p766_p5), %s855_s29, 256, %s860_s7, %s862_s8, %s701_s27, %s701_s27, %s702_s28  }
 0x234 PF: > { %p572_p0 = scmp.ge.s32.totalorder %s694_s18, 2  ;;  %s394_s30 = sand.u32 1, %s682_s15  }
 0x235   : > { %s395_s5 = scalar_lea.sflag [#allocation3], %s394_s30 }
 0x236   : > { %p567_p1 = pnand %p572_p0, %p770_p6 }
 0x238   : > { %677 = dma.done.wait (!%p567_p1), %s395_s5, 256  }
 0x239   : > { %679 = vsyncadd (!%p567_p1), %s395_s5, 4294967040  ;;  %p15_p2 = scmp.ge.s32.totalorder %s753_s21, 4   ;;  %s911_s15 = smov %s686_s16 }
 0x23a   : > { %s912_s16 = smov %s690_s17  ;;  %s913_s17 = smov %s764_s24 }
 0x23b   : > { %s914_s18 = smov %s753_s21  ;;  %17 = sbr.rel (!%p15_p2) target bundleno = 4 (0x4), region = 76 }
 0x242   :  { %400 = vsyncpa [#allocation3], 1 }
 0x243   :  { %402 = vsyncpa [#allocation3 + $0x1], 1 }
 0x244   :  { %403 = vsyncpa [#allocation4], 1 }
 0x245   :  { %405 = vsyncpa [#allocation4 + $0x1], 1 }

</bundles_post_ra>
